<compile_context>
chip_gen: v5e
topology: v5e:2x2
jax: 0.10.0
libtpu: 0.0.40
codegen_flags: <defaults>
</compile_context>

<pallas_src>
import functools

import jax
import jax.numpy as jnp
from jax import lax
from jax.experimental import pallas as pl
from jax.experimental.pallas import tpu as pltpu


def _balce_kernel(logit_ref, label_ref,
                  bg_ce_ref, bg_cnt_ref, fg_ce_ref, fg_cnt_ref,
                  *, hw):
    """Grid = (N, num_pixel_blocks).

    logit_ref: (1, C, TP) native dtype, pixels on the lane axis.
    label_ref: (1, 1, TP) int32.
    *_ref:     (1, TP) f32 VMEM-resident accumulators (constant output index),
               written back to HBM once at the end of the grid.
    """
    n = pl.program_id(0)
    p = pl.program_id(1)

    @pl.when((n == 0) & (p == 0))
    def _init():
        bg_ce_ref[...] = jnp.zeros_like(bg_ce_ref)
        bg_cnt_ref[...] = jnp.zeros_like(bg_cnt_ref)
        fg_ce_ref[...] = jnp.zeros_like(fg_ce_ref)
        fg_cnt_ref[...] = jnp.zeros_like(fg_cnt_ref)

    x = logit_ref[0].astype(jnp.float32)      # (C, TP), cast in VMEM
    lbl = label_ref[0]                        # (1, TP) int32
    c, tp = x.shape

    # Mask for the ragged tail tile: global pixel index must be < H*W.
    col = lax.broadcasted_iota(jnp.int32, (1, tp), 1)
    valid = (p * tp + col) < hw               # (1, TP) bool

    # log-softmax cross-entropy over the class (sublane) axis:
    #   CE = logsumexp(x) - x[label]
    m = jnp.max(x, axis=0, keepdims=True)                               # (1, TP)
    lse = m + jnp.log(jnp.sum(jnp.exp(x - m), axis=0, keepdims=True))   # (1, TP)
    row = lax.broadcasted_iota(jnp.int32, (c, tp), 0)                   # (C, TP)
    picked = jnp.sum(jnp.where(row == lbl, x, 0.0), axis=0, keepdims=True)
    ce = lse - picked                                                   # (1, TP)
    # For label==255 (ignore) no class matches -> picked=0, ce=lse (finite);
    # both masks are 0 there, matching ignore_index=255 exactly.
    # NOTE: assumes C <= 255 so the ignore value never aliases a real class.

    bg = valid & (lbl == 0)
    fg = valid & (lbl != 0) & (lbl != 255)

    # jnp.where (select, not multiply) so garbage in OOB tail lanes (possibly
    # NaN/Inf) can never leak into the accumulators.
    zero = jnp.zeros_like(ce)
    one = jnp.ones_like(ce)
    bg_ce_ref[...] += jnp.where(bg, ce, zero)
    bg_cnt_ref[...] += jnp.where(bg, one, zero)
    fg_ce_ref[...] += jnp.where(fg, ce, zero)
    fg_cnt_ref[...] += jnp.where(fg, one, zero)


def _pick_tile(hw, c, itemsize):
    """Pixel tile: ~2 MiB logit block per buffer, lane-aligned, VMEM-safe on
    v5e/v6e (128 MiB) and v7x (64 MiB) at the default scoped VMEM limit."""
    cap = (2 * 1024 * 1024) // max(1, c * itemsize)
    cap = max(512, min(65536, (cap // 128) * 128))
    if hw <= cap:
        return hw            # full pixel dim -> always a legal block shape
    return cap               # multiple of 128; ragged tail masked in-kernel


@jax.jit
def bal_ce(logit, label):
    """logit: (N, C, H, W) float (f32 or bf16); label: (N, H, W) int.
    Returns scalar f32 balanced CE."""
    N, C, H, W = logit.shape
    HW = H * W

    # Free reshapes only: no transpose, no dtype copy of the logits in HBM.
    x = logit.reshape(N, C, HW)
    lbl = label.reshape(N, 1, HW).astype(jnp.int32)   # labels are tiny

    tp = _pick_tile(HW, C, jnp.dtype(logit.dtype).itemsize)
    num_pb = pl.cdiv(HW, tp)

    acc_shape = jax.ShapeDtypeStruct((1, tp), jnp.float32)
    acc_spec = pl.BlockSpec((1, tp), lambda n, p: (0, 0))

    bg_ce, bg_cnt, fg_ce, fg_cnt = pl.pallas_call(
        functools.partial(_balce_kernel, hw=HW),
        out_shape=(acc_shape,) * 4,
        grid=(N, num_pb),
        in_specs=[
            pl.BlockSpec((1, C, tp), lambda n, p: (n, 0, p)),   # logits
            pl.BlockSpec((1, 1, tp), lambda n, p: (n, 0, p)),   # labels
        ],
        out_specs=(acc_spec,) * 4,
        compiler_params=pltpu.CompilerParams(
            dimension_semantics=("arbitrary", "arbitrary")),
    )(x, lbl)

    # Tiny final reductions over (1, TP) arrays.
    # NOTE: like the PyTorch module, this is NaN if there are no bg or no fg
    # pixels in the batch (division by zero) -- semantics kept identical.
    loss_bg = jnp.sum(bg_ce) / jnp.sum(bg_cnt)
    loss_fg = jnp.sum(fg_ce) / jnp.sum(fg_cnt)
    return (loss_bg + loss_fg) * 0.5


def _bal_ce_reference(logit, label):
    """Pure-JAX reference mirroring nn.CrossEntropyLoss(reduction='none',
    ignore_index=255) followed by the balanced averaging."""
    N, C, H, W = logit.shape
    x = jnp.transpose(logit, (0, 2, 3, 1)).reshape(-1, C).astype(jnp.float32)
    lbl = label.reshape(-1).astype(jnp.int32)
    lse = jax.nn.logsumexp(x, axis=-1)
    safe = jnp.where(lbl == 255, 0, lbl)
    picked = jnp.take_along_axis(x, safe[:, None], axis=-1)[:, 0]
    ce = jnp.where(lbl == 255, 0.0, lse - picked)
    bg = (lbl == 0).astype(jnp.float32)
    fg = jnp.logical_and(lbl != 0, lbl != 255).astype(jnp.float32)
    loss_bg = jnp.sum(ce * bg) / jnp.sum(bg)
    loss_fg = jnp.sum(ce * fg) / jnp.sum(fg)
    return (loss_bg + loss_fg) * 0.5


if __name__ == "__main__":
    # The module has no learnable parameters; only inputs are needed.
    key = jax.random.PRNGKey(0)
    k_logit, k_label = jax.random.split(key)

    N, C, H, W = 2, 4, 16, 16
    logit = jax.random.normal(k_logit, (N, C, H, W), dtype=jnp.float32)
    # labels in {0, ..., C-1} plus some ignored (255) pixels.
    raw = jax.random.randint(k_label, (N, H, W), 0, C + 1)
    label = jnp.where(raw == C, 255, raw).astype(jnp.int32)
    # Guarantee at least one background and one foreground pixel.
    label = label.at[0, 0, 0].set(0).at[0, 0, 1].set(1)

    out = bal_ce(logit, label)
    out = jax.block_until_ready(out)

    ref = _bal_ce_reference(logit, label)
    assert jnp.allclose(out, ref, rtol=1e-5, atol=1e-5), (out, ref)

    print("KERNEL_OK")
</pallas_src>

<mosaic_0001>
module attributes {stable_mosaic.version = 11 : i64} {
  func.func @_balce_kernel(%arg0: i32, %arg1: i32, %arg2: memref<1x4x256xf32, #tpu.memory_space<vmem>>, %arg3: memref<1x1x256xi32, #tpu.memory_space<vmem>>, %arg4: memref<1x256xf32, #tpu.memory_space<vmem>>, %arg5: memref<1x256xf32, #tpu.memory_space<vmem>>, %arg6: memref<1x256xf32, #tpu.memory_space<vmem>>, %arg7: memref<1x256xf32, #tpu.memory_space<vmem>>) attributes {dimension_semantics = [#tpu.dimension_semantics<arbitrary>, #tpu.dimension_semantics<arbitrary>], iteration_bounds = array<i64: 2, 1>, scalar_prefetch = 0 : i64, scratch_operands = 0 : i64, tpu.core_type = #tpu.core_type<tc>, window_params = [{transform_indices = @transform_0, window_bounds = array<i64: 1, 4, 256>}, {transform_indices = @transform_1, window_bounds = array<i64: 1, 1, 256>}, {pipeline_mode = #tpu.pipeline_mode<synchronous>, transform_indices = @transform_2, window_bounds = array<i64: 1, 256>}, {pipeline_mode = #tpu.pipeline_mode<synchronous>, transform_indices = @transform_3, window_bounds = array<i64: 1, 256>}, {pipeline_mode = #tpu.pipeline_mode<synchronous>, transform_indices = @transform_4, window_bounds = array<i64: 1, 256>}, {pipeline_mode = #tpu.pipeline_mode<synchronous>, transform_indices = @transform_5, window_bounds = array<i64: 1, 256>}]} {
    %c0_i32 = arith.constant 0 : i32
    %0 = arith.cmpi eq, %arg0, %c0_i32 : i32
    %c0_i32_0 = arith.constant 0 : i32
    %1 = arith.cmpi eq, %arg1, %c0_i32_0 : i32
    %2 = arith.andi %0, %1 : i1
    %3 = arith.extui %2 : i1 to i32
    %c0_i32_1 = arith.constant 0 : i32
    %4 = arith.cmpi ne, %3, %c0_i32_1 : i32
    scf.if %4 {
      %cst_31 = arith.constant 0.000000e+00 : f32
      %59 = vector.broadcast %cst_31 : f32 to vector<1x256xf32>
      %c0_32 = arith.constant 0 : index
      %c0_33 = arith.constant 0 : index
      %60 = vector.load %arg4[%c0_32, %c0_33] : memref<1x256xf32, #tpu.memory_space<vmem>>, vector<1x256xf32>
      tpu.vector_store %arg4[%c0_32, %c0_33], %59 {strides = array<i32>} : memref<1x256xf32, #tpu.memory_space<vmem>>, vector<1x256xf32>,
      %cst_34 = arith.constant 0.000000e+00 : f32
      %61 = vector.broadcast %cst_34 : f32 to vector<1x256xf32>
      %c0_35 = arith.constant 0 : index
      %c0_36 = arith.constant 0 : index
      %62 = vector.load %arg5[%c0_35, %c0_36] : memref<1x256xf32, #tpu.memory_space<vmem>>, vector<1x256xf32>
      tpu.vector_store %arg5[%c0_35, %c0_36], %61 {strides = array<i32>} : memref<1x256xf32, #tpu.memory_space<vmem>>, vector<1x256xf32>,
      %cst_37 = arith.constant 0.000000e+00 : f32
      %63 = vector.broadcast %cst_37 : f32 to vector<1x256xf32>
      %c0_38 = arith.constant 0 : index
      %c0_39 = arith.constant 0 : index
      %64 = vector.load %arg6[%c0_38, %c0_39] : memref<1x256xf32, #tpu.memory_space<vmem>>, vector<1x256xf32>
      tpu.vector_store %arg6[%c0_38, %c0_39], %63 {strides = array<i32>} : memref<1x256xf32, #tpu.memory_space<vmem>>, vector<1x256xf32>,
      %cst_40 = arith.constant 0.000000e+00 : f32
      %65 = vector.broadcast %cst_40 : f32 to vector<1x256xf32>
      %c0_41 = arith.constant 0 : index
      %c0_42 = arith.constant 0 : index
      %66 = vector.load %arg7[%c0_41, %c0_42] : memref<1x256xf32, #tpu.memory_space<vmem>>, vector<1x256xf32>
      tpu.vector_store %arg7[%c0_41, %c0_42], %65 {strides = array<i32>} : memref<1x256xf32, #tpu.memory_space<vmem>>, vector<1x256xf32>,
    } else {
    }
    %c0 = arith.constant 0 : index
    %c0_2 = arith.constant 0 : index
    %c0_3 = arith.constant 0 : index
    %5 = vector.load %arg2[%c0, %c0_2, %c0_3] : memref<1x4x256xf32, #tpu.memory_space<vmem>>, vector<1x4x256xf32>
    %6 = vector.shape_cast %5 : vector<1x4x256xf32> to vector<4x256xf32>
    %c0_4 = arith.constant 0 : index
    %c0_5 = arith.constant 0 : index
    %c0_6 = arith.constant 0 : index
    %7 = vector.load %arg3[%c0_4, %c0_5, %c0_6] : memref<1x1x256xi32, #tpu.memory_space<vmem>>, vector<1x1x256xi32>
    %8 = vector.shape_cast %7 : vector<1x1x256xi32> to vector<1x256xi32>
    %9 = tpu.iota {dimensions = array<i32: 1>} : vector<1x256xi32>
    %c256_i32 = arith.constant 256 : i32
    %10 = arith.muli %arg1, %c256_i32 : i32
    %11 = vector.broadcast %10 : i32 to vector<1x256xi32>
    %12 = arith.addi %11, %9 : vector<1x256xi32>
    %c256_i32_7 = arith.constant 256 : i32
    %13 = vector.broadcast %c256_i32_7 : i32 to vector<1x256xi32>
    %14 = arith.cmpi slt, %12, %13 : vector<1x256xi32>
    %cst = arith.constant dense<0xFF800000> : vector<256xf32>
    %15 = vector.multi_reduction <maximumf>, %6, %cst [0] : vector<4x256xf32> to vector<256xf32>
    %16 = vector.shape_cast %15 : vector<256xf32> to vector<1x256xf32>
    %17 = vector.broadcast %16 : vector<1x256xf32> to vector<4x256xf32>
    %18 = arith.subf %6, %17 : vector<4x256xf32>
    %19 = math.exp %18 : vector<4x256xf32>
    %cst_8 = arith.constant dense<0.000000e+00> : vector<256xf32>
    %20 = vector.multi_reduction <add>, %19, %cst_8 [0] : vector<4x256xf32> to vector<256xf32>
    %21 = vector.shape_cast %20 : vector<256xf32> to vector<1x256xf32>
    %22 = math.log %21 : vector<1x256xf32>
    %23 = arith.addf %16, %22 : vector<1x256xf32>
    %24 = tpu.iota {dimensions = array<i32: 0>} : vector<4x256xi32>
    %25 = vector.broadcast %8 : vector<1x256xi32> to vector<4x256xi32>
    %26 = arith.cmpi eq, %24, %25 : vector<4x256xi32>
    %cst_9 = arith.constant 0.000000e+00 : f32
    %27 = vector.broadcast %cst_9 : f32 to vector<4x256xf32>
    %28 = arith.select %26, %6, %27 : vector<4x256xi1>, vector<4x256xf32>
    %cst_10 = arith.constant dense<0.000000e+00> : vector<256xf32>
    %29 = vector.multi_reduction <add>, %28, %cst_10 [0] : vector<4x256xf32> to vector<256xf32>
    %30 = vector.shape_cast %29 : vector<256xf32> to vector<1x256xf32>
    %31 = arith.subf %23, %30 : vector<1x256xf32>
    %c0_i32_11 = arith.constant 0 : i32
    %32 = vector.broadcast %c0_i32_11 : i32 to vector<1x256xi32>
    %33 = arith.cmpi eq, %8, %32 : vector<1x256xi32>
    %34 = arith.andi %14, %33 : vector<1x256xi1>
    %c0_i32_12 = arith.constant 0 : i32
    %35 = vector.broadcast %c0_i32_12 : i32 to vector<1x256xi32>
    %36 = arith.cmpi ne, %8, %35 : vector<1x256xi32>
    %37 = arith.andi %14, %36 : vector<1x256xi1>
    %c255_i32 = arith.constant 255 : i32
    %38 = vector.broadcast %c255_i32 : i32 to vector<1x256xi32>
    %39 = arith.cmpi ne, %8, %38 : vector<1x256xi32>
    %40 = arith.andi %37, %39 : vector<1x256xi1>
    %cst_13 = arith.constant 0.000000e+00 : f32
    %41 = vector.broadcast %cst_13 : f32 to vector<1x256xf32>
    %cst_14 = arith.constant 1.000000e+00 : f32
    %42 = vector.broadcast %cst_14 : f32 to vector<1x256xf32>
    %c0_15 = arith.constant 0 : index
    %c0_16 = arith.constant 0 : index
    %43 = vector.load %arg4[%c0_15, %c0_16] : memref<1x256xf32, #tpu.memory_space<vmem>>, vector<1x256xf32>
    %44 = arith.select %34, %31, %41 : vector<1x256xi1>, vector<1x256xf32>
    %45 = arith.addf %43, %44 : vector<1x256xf32>
    %c0_17 = arith.constant 0 : index
    %c0_18 = arith.constant 0 : index
    %46 = vector.load %arg4[%c0_17, %c0_18] : memref<1x256xf32, #tpu.memory_space<vmem>>, vector<1x256xf32>
    tpu.vector_store %arg4[%c0_17, %c0_18], %45 {strides = array<i32>} : memref<1x256xf32, #tpu.memory_space<vmem>>, vector<1x256xf32>,
    %c0_19 = arith.constant 0 : index
    %c0_20 = arith.constant 0 : index
    %47 = vector.load %arg5[%c0_19, %c0_20] : memref<1x256xf32, #tpu.memory_space<vmem>>, vector<1x256xf32>
    %48 = arith.select %34, %42, %41 : vector<1x256xi1>, vector<1x256xf32>
    %49 = arith.addf %47, %48 : vector<1x256xf32>
    %c0_21 = arith.constant 0 : index
    %c0_22 = arith.constant 0 : index
    %50 = vector.load %arg5[%c0_21, %c0_22] : memref<1x256xf32, #tpu.memory_space<vmem>>, vector<1x256xf32>
    tpu.vector_store %arg5[%c0_21, %c0_22], %49 {strides = array<i32>} : memref<1x256xf32, #tpu.memory_space<vmem>>, vector<1x256xf32>,
    %c0_23 = arith.constant 0 : index
    %c0_24 = arith.constant 0 : index
    %51 = vector.load %arg6[%c0_23, %c0_24] : memref<1x256xf32, #tpu.memory_space<vmem>>, vector<1x256xf32>
    %52 = arith.select %40, %31, %41 : vector<1x256xi1>, vector<1x256xf32>
    %53 = arith.addf %51, %52 : vector<1x256xf32>
    %c0_25 = arith.constant 0 : index
    %c0_26 = arith.constant 0 : index
    %54 = vector.load %arg6[%c0_25, %c0_26] : memref<1x256xf32, #tpu.memory_space<vmem>>, vector<1x256xf32>
    tpu.vector_store %arg6[%c0_25, %c0_26], %53 {strides = array<i32>} : memref<1x256xf32, #tpu.memory_space<vmem>>, vector<1x256xf32>,
    %c0_27 = arith.constant 0 : index
    %c0_28 = arith.constant 0 : index
    %55 = vector.load %arg7[%c0_27, %c0_28] : memref<1x256xf32, #tpu.memory_space<vmem>>, vector<1x256xf32>
    %56 = arith.select %40, %42, %41 : vector<1x256xi1>, vector<1x256xf32>
    %57 = arith.addf %55, %56 : vector<1x256xf32>
    %c0_29 = arith.constant 0 : index
    %c0_30 = arith.constant 0 : index
    %58 = vector.load %arg7[%c0_29, %c0_30] : memref<1x256xf32, #tpu.memory_space<vmem>>, vector<1x256xf32>
    tpu.vector_store %arg7[%c0_29, %c0_30], %57 {strides = array<i32>} : memref<1x256xf32, #tpu.memory_space<vmem>>, vector<1x256xf32>,
    return
  }
  func.func @transform_0(%arg0: i32, %arg1: i32) -> (i32, i32, i32) {
    %c0_i32 = arith.constant 0 : i32
    %c0_i32_0 = arith.constant 0 : i32
    return %arg0, %c0_i32, %arg1 : i32, i32, i32
  }
  func.func @transform_1(%arg0: i32, %arg1: i32) -> (i32, i32, i32) {
    %c0_i32 = arith.constant 0 : i32
    %c0_i32_0 = arith.constant 0 : i32
    return %arg0, %c0_i32, %arg1 : i32, i32, i32
  }
  func.func @transform_2(%arg0: i32, %arg1: i32) -> (i32, i32) {
    %c0_i32 = arith.constant 0 : i32
    %c0_i32_0 = arith.constant 0 : i32
    %c0_i32_1 = arith.constant 0 : i32
    return %c0_i32, %c0_i32_0 : i32, i32
  }
  func.func @transform_3(%arg0: i32, %arg1: i32) -> (i32, i32) {
    %c0_i32 = arith.constant 0 : i32
    %c0_i32_0 = arith.constant 0 : i32
    %c0_i32_1 = arith.constant 0 : i32
    return %c0_i32, %c0_i32_0 : i32, i32
  }
  func.func @transform_4(%arg0: i32, %arg1: i32) -> (i32, i32) {
    %c0_i32 = arith.constant 0 : i32
    %c0_i32_0 = arith.constant 0 : i32
    %c0_i32_1 = arith.constant 0 : i32
    return %c0_i32, %c0_i32_0 : i32, i32
  }
  func.func @transform_5(%arg0: i32, %arg1: i32) -> (i32, i32) {
    %c0_i32 = arith.constant 0 : i32
    %c0_i32_0 = arith.constant 0 : i32
    %c0_i32_1 = arith.constant 0 : i32
    return %c0_i32, %c0_i32_0 : i32, i32
  }
}

</mosaic_0001>

<bundles_post_ra>
// kernel: bal_ce.1
= control target key start
LH: loop header
LB: loop body
LE: loop exit
PB: predicated region body
PF: predicated region fallthrough
CT: control target
= control target key end

     0   :  { %s618_s18 = smov 0   ;;  %s620_s19 = smov 0   ;;  %s786_s0 = inlined_call_operand.vmem [shape: f32[2,4,256], index: 0, kind: input, shape index: {}]   ;;  %s787_s1 = inlined_call_operand.vmem [shape: s32[2,1,256], index: 1, kind: input, shape index: {}]   ;;  %s788_s2 = inlined_call_operand.vmem [shape: f32[1,256], index: 2, kind: output, shape index: {0}]   ;;  %s789_s3 = inlined_call_operand.vmem [shape: f32[1,256], index: 3, kind: output, shape index: {1}]   ;;  %s790_s4 = inlined_call_operand.vmem [shape: f32[1,256], index: 4, kind: output, shape index: {2}]   ;;  %s791_s5 = inlined_call_operand.vmem [shape: f32[1,256], index: 5, kind: output, shape index: {3}]  }
   0x1   :  { %s622_s20 = smov 0  }
   0x2 LB: > { %s28_s21 = sadd.s32 1, %s579_s19  ;;  %p519_p0 = scmp.ge.s32.totalorder %s583_s20, 1  ;;  %s583_s20 = sphi %s622_s20, %s16_s20   ;;  %s579_s19 = sphi %s620_s19, %s807_s19   ;;  %s575_s18 = sphi %s618_s18, %s806_s18  }
   0x3   : > { %p30_p1 = scmp.ge.s32.totalorder %s28_s21, 2  ;;  %p209_p2 = scmp.lt.s32.totalorder %s583_s20, 3 }
   0x5   : > { %s809_s21 = smov (%p30_p1, %s28_s21), 0  ;;  %p210_p3 = pnand %p519_p0, %p209_p2 }
   0x6   : > { %p245_p4 = scmp.lt.s32.totalorder (!%p210_p3), %s575_s18, 1  ;;  %p263_p5 = scmp.eq.s32.totalorder (!%p210_p3), %s575_s18, 0 }
   0x7   : > { %213 = sbr.rel (%p210_p3) target bundleno = 97 (0x61), region = 28 }
   0xc   : > { %s811_s18 = smov (!%p245_p4, %s575_s18), 1  ;;  %268 = sbr.rel (!%p263_p5) target bundleno = 19 (0x13), region = 32  ;;  %v269_v0 = vlaneseq (%p263_p5)  ;;  %v585_v1 = vmov (%p263_p5), 0.0  }
   0xd   : > { %s526_s22 = sshll.u32 %s811_s18, 3  ;;  %s522_s23 = sshll.u32 %s811_s18, 1 }
   0xe   : > { %s252_s26 = scalar_lea.vmem %s786_s0, %s526_s22  ;;  %s642_s29 = scalar_lea.vmem %s787_s1, %s522_s23  ;;  %vm271_vm0 = vcmp.lt.s32.totalorder (%p263_p5), %v269_v0, 256 }
   0xf   : > { %273 = vst.msk [vmem:[%s788_s2] sm:$0x3] (%p263_p5), %vm271_vm0, %v585_v1 }
  0x10   : > { %274 = vst.msk [vmem:[%s789_s3] sm:$0x3] (%p263_p5), %vm271_vm0, %v585_v1 }
  0x11   : > { %275 = vst.msk [vmem:[%s790_s4] sm:$0x3] %vm271_vm0, %v585_v1 }
  0x12   : > { %276 = vst.msk [vmem:[%s791_s5] sm:$0x3] %vm271_vm0, %v585_v1 }
  0x13 PF: > { %v656_v2 = vld [vmem:[%s252_s26] sm:$0xff]  ;;  %vm294_vm1 = vcmask 1043456   ;;  %v586_v24 = vmov 0   ;;  %v343_v38 = vlaneseq  ;;  %vm402_vm10 = vcmask 1040384  }
  0x14   : > { %289 = vst [vmem:[#allocation1] ss:$2 sm:$0xff] %v656_v2  ;;  %v278_v23 = vld [vmem:[%s642_s29] sm:$0x3]  ;;  %v587_v41 = vmov 0.0  }
  0x15   : > { %vm380_vm2 = vcmp.ne.s32.totalorder %v278_v23, 0  ;;  %vm388_vm3 = vcmp.ne.s32.totalorder %v278_v23, 255  ;;  %vm372_vm4 = vcmp.eq.s32.totalorder %v278_v23, 0  ;;  %v344_v49 = vshrl.u32 %v343_v38, 7 }
  0x16   : > { %v381_v25 = vsel %vm380_vm2, 1, %v586_v24  ;;  %v389_v26 = vsel %vm388_vm3, 1, %v586_v24  ;;  %v373_v28 = vsel %vm372_vm4, 1, %v586_v24  ;;  %v345_v50 = vperm.slane %v278_v23, 0 }
  0x17   : > { %v382_v29 = vperm.slane %v381_v25, 0  ;;  %v383_v30 = vperm.slane %v381_v25, 1  ;;  %v390_v31 = vperm.slane %v389_v26, 0  ;;  %v374_v32 = vperm.slane %v373_v28, 0 }
  0x18   : > { %v375_v33 = vperm.slane %v373_v28, 1  ;;  %v391_v34 = vperm.slane %v389_v26, 1  ;;  %vm716_vm14 = vcmp.lt.s32.totalorder %v343_v38, 256  ;;  %v346_v63 = vperm.slane %v278_v23, 1 }
  0x19   : > { %vm670_vm5 = vcmp.ne.s32.totalorder %v382_v29, 0  ;;  %vm674_vm6 = vcmp.ne.s32.totalorder %v383_v30, 0  ;;  %vm678_vm7 = vcmp.ne.s32.totalorder %v390_v31, 0  ;;  %vm696_vm12 = vcmp.ne.s32.totalorder %v374_v32, 0  ;;  %v411_v52 = vld [vmem:[%s789_s3] sm:$0x3] }
  0x1a   : > { %vm682_vm8 = vcmp.ne.s32.totalorder %v375_v33, 0  ;;  %vm686_vm9 = vcmp.ne.s32.totalorder %v391_v34, 0  ;;  %vm394_vm13 = vmand %vm670_vm5, %vm678_vm7  ;;  %v412_v46 = vsel %vm696_vm12, 1.0, %v587_v41  ;;  %v431_v60 = vld [vmem:[%s791_s5] sm:$0x3]  ;;  %vm347_vm15 = vcmp.eq.s32.totalorder %v344_v49, %v345_v50 }
  0x1b   : > { %v290_v3 = vld.sshfl [vmem:[#allocation1] sm:$0xff pattern:$0x75316420]  ;;  %v291_v4 = vld.sshfl [vmem:[#allocation1 + $0x8] sm:$0xff pattern:$0x75316420]  ;;  %vm395_vm11 = vmand %vm674_vm6, %vm686_vm9  ;;  %vm348_vm0 = vcmp.eq.s32.totalorder %v344_v49, %v346_v63 }
  0x1c   : > { %v295_v5 = vsel %vm294_vm1, %v290_v3, -inf  ;;  %v302_v6 = vsel %vm294_vm1, %v291_v4, -inf  ;;  %v413_v42 = vsel %vm682_vm8, 1.0, %v587_v41  ;;  %v433_v45 = vsel %vm395_vm11, 1.0, %v587_v41 }
  0x1d   : > { %v296_v7 = vrot.slane %v295_v5, 4  ;;  %v303_v8 = vrot.slane %v302_v6, 4  ;;  %v416_v44 = vrot.slane %v413_v42, 7  ;;  %v432_v47 = vsel %vm394_vm13, 1.0, %v587_v41 }
  0x1e   : > { %v436_v48 = vrot.slane %v433_v45, 7 }
  0x1f   : > { %v297_v9 = vmax.f32 %v295_v5, %v296_v7  ;;  %v304_v10 = vmax.f32 %v302_v6, %v303_v8  ;;  %v417_v53 = vsel %vm402_vm10, %v412_v46, %v416_v44 }
  0x20   : > { %v419_v56 = vadd.f32 %v417_v53, %v411_v52  ;;  %v437_v57 = vsel %vm402_vm10, %v432_v47, %v436_v48  ;;  %v396_v47 = vld [vmem:[%s788_s2] sm:$0x3] }
  0x21   : > { %v298_v11 = vrot.slane %v297_v9, 2  ;;  %v305_v12 = vrot.slane %v304_v10, 2  ;;  %v439_v0 = vadd.f32 %v437_v57, %v431_v60 }
  0x22   : > { %420 = vst.msk [vmem:[%s789_s3] sm:$0x3] %vm716_vm14, %v419_v56 }
  0x23   : > { %v299_v13 = vmax.f32 %v297_v9, %v298_v11  ;;  %v306_v14 = vmax.f32 %v304_v10, %v305_v12  ;;  %440 = vst.msk [vmem:[%s791_s5] sm:$0x3] %vm716_vm14, %v439_v0 }
  0x25   : > { %v300_v15 = vrot.slane %v299_v13, 1  ;;  %v307_v16 = vrot.slane %v306_v14, 1 }
  0x27   : > { %v661_v17 = vmax.f32 %v306_v14, %v307_v16  ;;  %v663_v18 = vmax.f32 %v299_v13, %v300_v15 }
  0x29   : > { %v311_v19 = vrot.slane %v661_v17, 4 }
  0x2b   : > { %v312_v20 = vsel %vm294_vm1, %v663_v18, %v311_v19 }
  0x2c   : > { %v314_v21 = vsub.f32 %v656_v2, %v312_v20 }
  0x2e   : > { %v315_v22 = vmul.f32 1.442695, %v314_v21 }
  0x30   : > { %555 = vpow2.f32 %v315_v22 }
  0x36   : > { %v556_v27 = vpop.eup %555 }
  0x37   : > { %318 = vst [vmem:[#allocation1] ss:$2 sm:$0xff] %v556_v27 }
  0x3e   : > { %v319_v54 = vld.sshfl [vmem:[#allocation1] sm:$0xff pattern:$0x75316420]  ;;  %v320_v55 = vld.sshfl [vmem:[#allocation1 + $0x8] sm:$0xff pattern:$0x75316420] }
  0x3f   : > { %v323_v58 = vsel %vm294_vm1, %v319_v54, 0.0  ;;  %v330_v59 = vsel %vm294_vm1, %v320_v55, 0.0  ;;  %349 = vst [vmem:[#allocation1] ss:$2 sm:$0xff] %v656_v2 }
  0x40   : > { %v324_v61 = vrot.slane %v323_v58, 4  ;;  %v331_v62 = vrot.slane %v330_v59, 4 }
  0x42   : > { %v325_v1 = vadd.f32 %v324_v61, %v323_v58  ;;  %v332_v3 = vadd.f32 %v331_v62, %v330_v59 }
  0x44   : > { %v326_v2 = vrot.slane %v325_v1, 2  ;;  %v333_v4 = vrot.slane %v332_v3, 2 }
  0x46   : > { %v327_v5 = vadd.f32 %v326_v2, %v325_v1  ;;  %v334_v6 = vadd.f32 %v333_v4, %v332_v3  ;;  %v350_v7 = vld.sshfl [vmem:[#allocation1] sm:$0xff pattern:$0x75316420]  ;;  %v351_v8 = vld.sshfl [vmem:[#allocation1 + $0x8] sm:$0xff pattern:$0x75316420] }
  0x47   : > { %v354_v9 = vsel %vm347_vm15, %v350_v7, 0.0  ;;  %v355_v10 = vsel %vm348_vm0, %v351_v8, 0.0 }
  0x48   : > { %v328_v11 = vrot.slane %v327_v5, 1  ;;  %v335_v12 = vrot.slane %v334_v6, 1  ;;  %v356_v13 = vsel %vm294_vm1, %v354_v9, 0.0  ;;  %v363_v14 = vsel %vm294_vm1, %v355_v10, 0.0 }
  0x49   : > { %v357_v15 = vrot.slane %v356_v13, 4  ;;  %v364_v16 = vrot.slane %v363_v14, 4 }
  0x4a   : > { %v336_v19 = vadd.f32 %v335_v12, %v334_v6  ;;  %v329_v20 = vadd.f32 %v328_v11, %v327_v5 }
  0x4b   : > { %v358_v21 = vadd.f32 %v357_v15, %v356_v13  ;;  %v365_v22 = vadd.f32 %v364_v16, %v363_v14 }
  0x4c   : > { %557 = vlog2.f32 %v336_v19 }
  0x4d   : > { %559 = vlog2.f32 %v329_v20  ;;  %v359_v23 = vrot.slane %v358_v21, 2  ;;  %v366_v24 = vrot.slane %v365_v22, 2 }
  0x4f   : > { %v360_v25 = vadd.f32 %v359_v23, %v358_v21  ;;  %v367_v26 = vadd.f32 %v366_v24, %v365_v22 }
  0x51   : > { %v368_v27 = vrot.slane %v367_v26, 1  ;;  %v361_v29 = vrot.slane %v360_v25, 1 }
  0x52   : > { %v558_v28 = vpop.eup %557 }
  0x53   : > { %v560_v30 = vpop.eup %559  ;;  %v340_v31 = vmul.f32 0.6931472, %v558_v28  ;;  %v369_v34 = vadd.f32 %v368_v27, %v367_v26  ;;  %v362_v41 = vadd.f32 %v361_v29, %v360_v25 }
  0x54   : > { %v338_v32 = vmul.f32 0.6931472, %v560_v30 }
  0x55   : > { %v342_v33 = vadd.f32 %v340_v31, %v661_v17 }
  0x56   : > { %v341_v38 = vadd.f32 %v338_v32, %v663_v18  ;;  %v421_v18 = vld [vmem:[%s790_s4] sm:$0x3] }
  0x57   : > { %v371_v42 = vsub.f32 %v342_v33, %v369_v34 }
  0x58   : > { %v370_v44 = vsub.f32 %v341_v38, %v362_v41 }
  0x59   : > { %v398_v45 = vsel %vm682_vm8, %v371_v42, 0.0  ;;  %v423_v46 = vsel %vm395_vm11, %v371_v42, 0.0 }
  0x5a   : > { %v401_v17 = vrot.slane %v398_v45, 7  ;;  %v426_v48 = vrot.slane %v423_v46, 7  ;;  %v397_v39 = vsel %vm696_vm12, %v370_v44, 0.0  ;;  %v422_v36 = vsel %vm394_vm13, %v370_v44, 0.0 }
  0x5c   : > { %v403_v40 = vsel %vm402_vm10, %v397_v39, %v401_v17  ;;  %v427_v49 = vsel %vm402_vm10, %v422_v36, %v426_v48 }
  0x5d   : > { %v405_v50 = vadd.f32 %v403_v40, %v396_v47  ;;  %v429_v52 = vadd.f32 %v427_v49, %v421_v18 }
  0x5f   : > { %410 = vst.msk [vmem:[%s788_s2] sm:$0x3] %vm716_vm14, %v405_v50 }
  0x60   : > { %430 = vst.msk [vmem:[%s790_s4] sm:$0x3] %vm716_vm14, %v429_v52 }
  0x61 PF: > { %s16_s20 = sadd.s32 1, %s583_s20   ;;  %s806_s18 = smov %s579_s19 }
  0x62   : > { %p13_p6 = scmp.ge.s32.totalorder %s16_s20, 4   ;;  %s807_s19 = smov %s809_s21 }
  0x64   :  { %15 = sbr.rel (!%p13_p6) target bundleno = 2 (0x2), region = 85 }

</bundles_post_ra>
